<compile_context>
chip_gen: v6e
topology: v6e:2x2x1
jax: 0.10.0
libtpu: 0.0.40
codegen_flags: <defaults>
</compile_context>

<pallas_src>
import math
from functools import partial

import numpy as np
import jax
import jax.numpy as jnp
from jax.experimental import pallas as pl
from jax.experimental.pallas import tpu as pltpu


# --------------------------------------------------------------------------- #
# Helpers
# --------------------------------------------------------------------------- #
def _round_up(x, m):
    return ((x + m - 1) // m) * m


def _sublane_multiple(dtype):
    """Minimum second-to-last tile multiple for a dtype (8/16/32 for 4/2/1 B)."""
    itemsize = jnp.dtype(dtype).itemsize
    return 8 if itemsize >= 4 else 8 * (4 // itemsize)


def _pick_feature_tile(requested, padded_dim):
    """Largest multiple of 128 that divides `padded_dim` and is <= `requested`."""
    if padded_dim <= requested:
        return padded_dim
    best = 128
    d = 256
    while d <= requested:
        if padded_dim % d == 0:
            best = d
        d += 128
    return best


def _vmem_budget_bytes():
    """Per-generation VMEM budget with headroom (v5e/v6e ~96 MiB, v7x ~48 MiB)."""
    try:
        cap = int(pltpu.get_tpu_info().vmem_capacity_bytes)
    except Exception:
        cap = 64 * 1024 * 1024  # conservative fallback (v7x per-TC physical)
    return max(cap * 3 // 4, 16 * 1024 * 1024)


# --------------------------------------------------------------------------- #
# Kernels
# --------------------------------------------------------------------------- #
def _gmm_kernel_acc(eids_ref, rows_ref, valid_ref, x_ref, w_ref, b_ref, o_ref,
                    acc_ref):
    # Multi-K-step path: f32 accumulator across the trailing ("arbitrary") K axis.
    #   x_ref : (tm, tk)      w_ref : (1, tk, tn)    b_ref : (1, 1, tn) f32
    #   o_ref : (tm, tn)      acc_ref: (tm, tn) f32 scratch
    del eids_ref, rows_ref
    i = pl.program_id(1)
    k = pl.program_id(2)
    nk = pl.num_programs(2)
    v = valid_ref[i]

    @pl.when(v == 1)
    def _work():
        @pl.when(k == 0)
        def _init():
            acc_ref[...] = jnp.zeros_like(acc_ref)

        acc_ref[...] += jnp.dot(
            x_ref[...], w_ref[0], preferred_element_type=jnp.float32
        )

        @pl.when(k == nk - 1)
        def _store():
            o_ref[...] = (acc_ref[...] + b_ref[0]).astype(o_ref.dtype)

    # Dead (padding-only) tiles: keep the never-gathered padded rows deterministic.
    @pl.when((v == 0) & (k == nk - 1))
    def _zero():
        o_ref[...] = jnp.zeros_like(o_ref)


def _gmm_kernel_fused(eids_ref, rows_ref, valid_ref, x_ref, w_ref, b_ref, o_ref):
    # Single-K-step fast path: no accumulator scratch, bias fused into the store.
    del eids_ref, rows_ref
    i = pl.program_id(1)
    v = valid_ref[i]

    @pl.when(v == 1)
    def _work():
        acc = jnp.dot(x_ref[...], w_ref[0], preferred_element_type=jnp.float32)
        o_ref[...] = (acc + b_ref[0]).astype(o_ref.dtype)

    @pl.when(v == 0)
    def _zero():
        o_ref[...] = jnp.zeros_like(o_ref)


# --------------------------------------------------------------------------- #
# Weight preparation (hoist out of the per-call path and cache!)
# --------------------------------------------------------------------------- #
def prepare_expert_params(weight, bias=None, *, compute_dtype=None,
                          bias_dtype=jnp.float32):
    """One-time layout work for the expert parameters.

    Transposes weight to (E, in_feat, out_feat) so out_feat lands on the MXU /
    store lane axis, zero-pads both feature dims to multiples of 128 and casts
    to `compute_dtype` (default: keep the weight dtype).  Cache the result and
    pass it to `fmoe_linear(..., prepared=True, out_feat=out_feat)` so this
    full-weight HBM pass is not repeated every forward call.
    """
    num_expert, out_feat, in_feat = weight.shape
    k_pad = _round_up(in_feat, 128)
    n_pad = _round_up(out_feat, 128)
    cdt = weight.dtype if compute_dtype is None else compute_dtype

    w_t = jnp.swapaxes(weight, 1, 2)  # (E, in_feat, out_feat)
    if (k_pad, n_pad) != (in_feat, out_feat):
        w_t = jnp.pad(w_t, ((0, 0), (0, k_pad - in_feat), (0, n_pad - out_feat)))
    w_t = w_t.astype(cdt)

    if bias is None:
        b_p = jnp.zeros((num_expert, 1, n_pad), bias_dtype)
    else:
        b_p = bias.astype(bias_dtype)
        if n_pad != out_feat:
            b_p = jnp.pad(b_p, ((0, 0), (0, n_pad - out_feat)))
        b_p = b_p.reshape(num_expert, 1, n_pad)
    return w_t, b_p


# --------------------------------------------------------------------------- #
# Grouped expert linear
# --------------------------------------------------------------------------- #
def fmoe_linear(inp, fwd_expert_count, weight, bias=None, *,
                prepared=False, out_feat=None,
                tm=256, tn=1024, tk=512,
                compute_dtype=None, out_dtype=None):
    """out[t] = inp[t] @ weight[e(t)].T + bias[e(t)]  (FMoELinear forward).

    `inp` rows must be grouped contiguously by expert (expert 0 first) with
    `fwd_expert_count[e]` rows for expert e.

    Fast path for repeated calls (weight prep hoisted & cached by the caller):
        w_t, b_p = prepare_expert_params(weight, bias, compute_dtype=...)
        out = fmoe_linear(x, counts, w_t, b_p, prepared=True, out_feat=out_feat)
    """
    total_tokens, in_feat = inp.shape

    if prepared:
        if out_feat is None:
            raise ValueError("out_feat is required when prepared=True")
        w_t, b_p = weight, bias
        num_expert, k_pad, n_pad = w_t.shape
        if k_pad != _round_up(in_feat, 128):
            raise ValueError("prepared weight does not match inp's in_feat")
        if b_p is None or b_p.shape != (num_expert, 1, n_pad):
            raise ValueError("prepared bias must come from prepare_expert_params")
    else:
        num_expert, w_out_feat, w_in_feat = weight.shape
        if w_in_feat != in_feat:
            raise ValueError("weight in_feat does not match inp")
        out_feat = w_out_feat
        # Per-call fallback; prefer prepare_expert_params() + prepared=True.
        w_t, b_p = prepare_expert_params(weight, bias, compute_dtype=compute_dtype)
        _, k_pad, n_pad = w_t.shape

    cdt = w_t.dtype
    odt = inp.dtype if out_dtype is None else out_dtype

    if total_tokens == 0:
        return jnp.zeros((0, out_feat), dtype=odt)

    # Eager consistency check (silently skipped when traced under jit).
    try:
        tot = int(jnp.sum(fwd_expert_count))
    except jax.errors.ConcretizationTypeError:
        tot = None
    if tot is not None and tot != total_tokens:
        raise ValueError("fwd_expert_count.sum() must equal inp.shape[0]")

    # ---- Tile selection (dtype-aware, clamped to data and VMEM budget) -----
    min_sub = max(_sublane_multiple(cdt), _sublane_multiple(odt))
    tm_eff = max(min_sub, min(_round_up(tm, min_sub),
                              _round_up(total_tokens, min_sub)))
    tn_eff = _pick_feature_tile(max(tn, 128), n_pad)
    tk_eff = _pick_feature_tile(max(tk, 128), k_pad)

    csize = jnp.dtype(cdt).itemsize
    osize = jnp.dtype(odt).itemsize
    budget = _vmem_budget_bytes()

    def _inflight(tm_, tn_, tk_):
        return (2 * tm_ * tk_ * csize        # x double buffer
                + 2 * tk_ * tn_ * csize      # weight double buffer
                + 2 * tn_ * 4                # bias double buffer
                + 2 * tm_ * tn_ * osize      # output double buffer
                + tm_ * tn_ * 4)             # f32 accumulator

    while _inflight(tm_eff, tn_eff, tk_eff) > budget:
        if tk_eff >= tn_eff and tk_eff > 128:
            tk_eff = _pick_feature_tile(tk_eff // 2, k_pad)
        elif tn_eff > 128:
            tn_eff = _pick_feature_tile(tn_eff // 2, n_pad)
        elif tm_eff > min_sub:
            tm_eff = max(min_sub, _round_up(tm_eff // 2, min_sub))
        else:
            break

    n_tiles = n_pad // tn_eff
    k_tiles = k_pad // tk_eff
    # Static worst case: sum_e ceil(c_e/tm) <= ceil(T/tm) + E.
    num_m_tiles = (total_tokens + tm_eff - 1) // tm_eff + num_expert
    m_pad = num_m_tiles * tm_eff
    multi_k = k_tiles > 1

    # ---- On-device metadata (no host sync; jittable) ------------------------
    counts = fwd_expert_count.astype(jnp.int32)
    ends = jnp.cumsum(counts)
    starts = ends - counts
    tiles_per_expert = (counts + tm_eff - 1) // tm_eff
    padded_counts = tiles_per_expert * tm_eff
    pad_ends = jnp.cumsum(padded_counts)
    pad_starts = pad_ends - padded_counts

    tok = jnp.arange(total_tokens, dtype=jnp.int32)
    tok_eid = jnp.searchsorted(ends, tok, side="right").astype(jnp.int32)
    pad_pos = pad_starts[tok_eid] + (tok - starts[tok_eid])

    num_real_tiles = jnp.sum(tiles_per_expert).astype(jnp.int32)  # >= 1 here
    last_valid = jnp.maximum(num_real_tiles - 1, 0)

    tile_idx = jnp.arange(num_m_tiles, dtype=jnp.int32)
    tile_valid = (tile_idx < num_real_tiles).astype(jnp.int32)
    eid_raw = jnp.minimum(
        jnp.searchsorted(pad_ends, tile_idx * tm_eff, side="right").astype(jnp.int32),
        num_expert - 1,
    )
    # Dead tiles are frozen onto the last real tile so their input index_maps
    # repeat the previous block indices and the pipeline issues no fresh DMAs.
    tile_row = jnp.where(tile_valid == 1, tile_idx, last_valid)
    tile_eid = jnp.where(tile_valid == 1, eid_raw, eid_raw[last_valid])

    # ---- Activation scatter into tile-aligned padded rows -------------------
    x_c = inp
    if k_pad != in_feat:
        x_c = jnp.pad(x_c, ((0, 0), (0, k_pad - in_feat)))
    x_c = x_c.astype(cdt)
    x_pad = jnp.zeros((m_pad, k_pad), dtype=cdt).at[pad_pos].set(x_c)
    # TODO(synk): megablox-style masked grouped matmul over the un-padded token
    #             buffer would remove this scatter and the final gather.

    # ---- Index maps (N leading so 2-TC chips shard disjoint weight columns) -
    def x_map(j, i, k, eids, rows, valid):
        v = valid[i]
        return (rows[i], v * k + (1 - v) * (k_tiles - 1))

    def w_map(j, i, k, eids, rows, valid):
        v = valid[i]
        return (eids[i], v * k + (1 - v) * (k_tiles - 1), j)

    def b_map(j, i, k, eids, rows, valid):
        return (eids[i], 0, j)

    def o_map(j, i, k, eids, rows, valid):
        return (i, j)

    kernel = _gmm_kernel_acc if multi_k else _gmm_kernel_fused
    scratch = [pltpu.VMEM((tm_eff, tn_eff), jnp.float32)] if multi_k else []

    grid_spec = pltpu.PrefetchScalarGridSpec(
        num_scalar_prefetch=3,
        grid=(n_tiles, num_m_tiles, k_tiles),
        in_specs=[
            pl.BlockSpec((tm_eff, tk_eff), x_map),
            pl.BlockSpec((1, tk_eff, tn_eff), w_map),
            pl.BlockSpec((1, 1, tn_eff), b_map),
        ],
        out_specs=pl.BlockSpec((tm_eff, tn_eff), o_map),
        scratch_shapes=scratch,
    )

    cost = pl.CostEstimate(
        flops=int(2 * m_pad * k_pad * n_pad),
        transcendentals=0,
        bytes_accessed=int(
            num_m_tiles * k_pad * n_pad * csize   # weight tiles
            + n_tiles * m_pad * k_pad * csize     # activation tiles
            + m_pad * n_pad * osize               # output
        ),
    )

    out_pad = pl.pallas_call(
        kernel,
        out_shape=jax.ShapeDtypeStruct((m_pad, n_pad), odt),
        grid_spec=grid_spec,
        compiler_params=pltpu.CompilerParams(
            dimension_semantics=("parallel", "parallel", "arbitrary"),
            vmem_limit_bytes=int(budget),
        ),
        cost_estimate=cost,
    )(tile_eid, tile_row, tile_valid, x_pad, w_t, b_p)

    # Gather results back to the original token order / true out_feat.
    return jnp.take(out_pad, pad_pos, axis=0)[:, :out_feat]


# --------------------------------------------------------------------------- #
# Parameter init matching the PyTorch module
# --------------------------------------------------------------------------- #
def init_params(key, num_expert, in_feat, out_feat):
    # torch.nn.init.kaiming_uniform_(weight, a=sqrt(5)) on a
    # (num_expert, out_feat, in_feat) tensor: fan_in = out_feat * in_feat,
    # bound = sqrt(6 / ((1 + a^2) * fan_in)) = sqrt(1 / fan_in).
    fan_in = out_feat * in_feat
    bound = math.sqrt(1.0 / fan_in)
    weight = jax.random.uniform(
        key, (num_expert, out_feat, in_feat), jnp.float32, -bound, bound
    )
    bias = jnp.zeros((num_expert, out_feat), jnp.float32)
    return weight, bias


def _reference(inp, counts, weight, bias, compute_dtype=None):
    """Pure NumPy/JAX reference with optional compute-dtype rounding of x / W."""
    x = jnp.asarray(inp, jnp.float32)
    w = jnp.asarray(weight, jnp.float32)
    if compute_dtype is not None:
        x = x.astype(compute_dtype).astype(jnp.float32)
        w = w.astype(compute_dtype).astype(jnp.float32)
    x = np.asarray(x)
    w = np.asarray(w)
    b = np.asarray(bias, dtype=np.float32)
    counts = np.asarray(counts)
    offs = np.concatenate([[0], np.cumsum(counts)]).astype(np.int64)
    parts = [x[offs[e]:offs[e + 1]] @ w[e].T + b[e] for e in range(len(counts))]
    return np.concatenate(parts, axis=0)


if __name__ == "__main__":
    num_expert, in_feat, out_feat = 4, 32, 64
    # Tokens per expert (one expert intentionally empty).
    fwd_expert_count = jnp.array([3, 2, 0, 3], dtype=jnp.int32)
    total_tokens = int(np.asarray(fwd_expert_count).sum())

    key = jax.random.PRNGKey(0)
    k_w, k_x, k_b, k_w2, k_x2, k_b2 = jax.random.split(key, 6)
    weight, bias = init_params(k_w, num_expert, in_feat, out_feat)
    # Non-zero bias just to exercise the bias-add path in the demo.
    bias = 0.1 * jax.random.normal(k_b, (num_expert, out_feat), jnp.float32)
    inp = jax.random.normal(k_x, (total_tokens, in_feat), jnp.float32)

    # ---- Path 1: cached prepared weights (recommended), f32 compute,
    #              single-K fused kernel. -----------------------------------
    w_prep, b_prep = prepare_expert_params(weight, bias)   # hoist & cache this
    run_prepared = jax.jit(partial(fmoe_linear, prepared=True, out_feat=out_feat))
    out = jax.block_until_ready(run_prepared(inp, fwd_expert_count, w_prep, b_prep))

    ref = _reference(inp, fwd_expert_count, weight, bias)
    assert out.shape == (total_tokens, out_feat)
    assert out.dtype == inp.dtype
    np.testing.assert_allclose(np.asarray(out), ref, rtol=2e-2, atol=2e-2)

    # ---- Path 2: convenience wrapper, bf16 compute, multi-K accumulator. ---
    in2, out2 = 256, 128
    w2, _ = init_params(k_w2, num_expert, in2, out2)
    b2 = 0.1 * jax.random.normal(k_b2, (num_expert, out2), jnp.float32)
    x2 = jax.random.normal(k_x2, (total_tokens, in2), jnp.float32)
    run_bf16 = jax.jit(partial(fmoe_linear, tk=128, compute_dtype=jnp.bfloat16))
    out2v = jax.block_until_ready(run_bf16(x2, fwd_expert_count, w2, b2))

    ref2 = _reference(x2, fwd_expert_count, w2, b2, compute_dtype=jnp.bfloat16)
    assert out2v.shape == (total_tokens, out2)
    np.testing.assert_allclose(np.asarray(out2v), ref2, rtol=2e-2, atol=2e-2)

    print("KERNEL_OK")
</pallas_src>

<mosaic_0001>
module attributes {stable_mosaic.version = 11 : i64} {
  func.func @_gmm_kernel_fused(%arg0: i32, %arg1: i32, %arg2: i32, %arg3: memref<5xi32, #tpu.memory_space<smem>>, %arg4: memref<5xi32, #tpu.memory_space<smem>>, %arg5: memref<5xi32, #tpu.memory_space<smem>>, %arg6: memref<8x128xf32, #tpu.memory_space<vmem>>, %arg7: memref<1x128x128xf32, #tpu.memory_space<vmem>>, %arg8: memref<1x1x128xf32, #tpu.memory_space<vmem>>, %arg9: memref<8x128xf32, #tpu.memory_space<vmem>>) attributes {dimension_semantics = [#tpu.dimension_semantics<parallel>, #tpu.dimension_semantics<parallel>, #tpu.dimension_semantics<arbitrary>], iteration_bounds = array<i64: 1, 5, 1>, scalar_prefetch = 3 : i64, scratch_operands = 0 : i64, tpu.core_type = #tpu.core_type<tc>, window_params = [{transform_indices = @transform_0, window_bounds = array<i64: 8, 128>}, {transform_indices = @transform_1, window_bounds = array<i64: 1, 128, 128>}, {transform_indices = @transform_2, window_bounds = array<i64: 1, 1, 128>}, {transform_indices = @transform_3, window_bounds = array<i64: 8, 128>}]} {
    %0 = arith.index_cast %arg1 : i32 to index
    %1 = memref.load %arg5[%0] : memref<5xi32, #tpu.memory_space<smem>>
    %c1_i32 = arith.constant 1 : i32
    %2 = arith.cmpi eq, %1, %c1_i32 : i32
    %3 = arith.extui %2 : i1 to i32
    %c0_i32 = arith.constant 0 : i32
    %4 = arith.cmpi ne, %3, %c0_i32 : i32
    scf.if %4 {
      %c0 = arith.constant 0 : index
      %c0_2 = arith.constant 0 : index
      %8 = vector.load %arg6[%c0, %c0_2] : memref<8x128xf32, #tpu.memory_space<vmem>>, vector<8x128xf32>
      %c0_3 = arith.constant 0 : index
      %c0_4 = arith.constant 0 : index
      %c0_5 = arith.constant 0 : index
      %9 = vector.load %arg7[%c0_3, %c0_4, %c0_5] : memref<1x128x128xf32, #tpu.memory_space<vmem>>, vector<1x128x128xf32>
      %10 = vector.shape_cast %9 : vector<1x128x128xf32> to vector<128x128xf32>
      %cst = arith.constant dense<0.000000e+00> : vector<8x128xf32>
      %11 = tpu.matmul %8, %10, %cst {dimension_numbers = #tpu.dot_dimension_numbers<[1], [0], [0], [1], [0, 0, 1, 1], [], []>} : vector<8x128xf32>, vector<128x128xf32>, vector<8x128xf32> -> vector<8x128xf32>
      %c0_6 = arith.constant 0 : index
      %c0_7 = arith.constant 0 : index
      %c0_8 = arith.constant 0 : index
      %12 = vector.load %arg8[%c0_6, %c0_7, %c0_8] : memref<1x1x128xf32, #tpu.memory_space<vmem>>, vector<1x1x128xf32>
      %13 = vector.shape_cast %12 : vector<1x1x128xf32> to vector<1x128xf32>
      %14 = vector.broadcast %13 : vector<1x128xf32> to vector<8x128xf32>
      %15 = arith.addf %11, %14 : vector<8x128xf32>
      %c0_9 = arith.constant 0 : index
      %c0_10 = arith.constant 0 : index
      %16 = vector.load %arg9[%c0_9, %c0_10] : memref<8x128xf32, #tpu.memory_space<vmem>>, vector<8x128xf32>
      tpu.vector_store %arg9[%c0_9, %c0_10], %15 {strides = array<i32>} : memref<8x128xf32, #tpu.memory_space<vmem>>, vector<8x128xf32>,
    } else {
    }
    %c0_i32_0 = arith.constant 0 : i32
    %5 = arith.cmpi eq, %1, %c0_i32_0 : i32
    %6 = arith.extui %5 : i1 to i32
    %c0_i32_1 = arith.constant 0 : i32
    %7 = arith.cmpi ne, %6, %c0_i32_1 : i32
    scf.if %7 {
      %cst = arith.constant 0.000000e+00 : f32
      %8 = vector.broadcast %cst : f32 to vector<8x128xf32>
      %c0 = arith.constant 0 : index
      %c0_2 = arith.constant 0 : index
      %9 = vector.load %arg9[%c0, %c0_2] : memref<8x128xf32, #tpu.memory_space<vmem>>, vector<8x128xf32>
      tpu.vector_store %arg9[%c0, %c0_2], %8 {strides = array<i32>} : memref<8x128xf32, #tpu.memory_space<vmem>>, vector<8x128xf32>,
    } else {
    }
    return
  }
  func.func @transform_0(%arg0: i32, %arg1: i32, %arg2: i32, %arg3: memref<5xi32, #tpu.memory_space<smem>>, %arg4: memref<5xi32, #tpu.memory_space<smem>>, %arg5: memref<5xi32, #tpu.memory_space<smem>>) -> (i32, i32) {
    %0 = arith.index_cast %arg1 : i32 to index
    %1 = memref.load %arg5[%0] : memref<5xi32, #tpu.memory_space<smem>>
    %2 = arith.index_cast %arg1 : i32 to index
    %3 = memref.load %arg4[%2] : memref<5xi32, #tpu.memory_space<smem>>
    %4 = arith.muli %1, %arg2 : i32
    %c1_i32 = arith.constant 1 : i32
    %5 = arith.subi %c1_i32, %1 : i32
    %c0_i32 = arith.constant 0 : i32
    %6 = arith.muli %5, %c0_i32 : i32
    %7 = arith.addi %4, %6 : i32
    %c0_i32_0 = arith.constant 0 : i32
    return %3, %7 : i32, i32
  }
  func.func @transform_1(%arg0: i32, %arg1: i32, %arg2: i32, %arg3: memref<5xi32, #tpu.memory_space<smem>>, %arg4: memref<5xi32, #tpu.memory_space<smem>>, %arg5: memref<5xi32, #tpu.memory_space<smem>>) -> (i32, i32, i32) {
    %0 = arith.index_cast %arg1 : i32 to index
    %1 = memref.load %arg5[%0] : memref<5xi32, #tpu.memory_space<smem>>
    %2 = arith.index_cast %arg1 : i32 to index
    %3 = memref.load %arg3[%2] : memref<5xi32, #tpu.memory_space<smem>>
    %4 = arith.muli %1, %arg2 : i32
    %c1_i32 = arith.constant 1 : i32
    %5 = arith.subi %c1_i32, %1 : i32
    %c0_i32 = arith.constant 0 : i32
    %6 = arith.muli %5, %c0_i32 : i32
    %7 = arith.addi %4, %6 : i32
    %c0_i32_0 = arith.constant 0 : i32
    return %3, %7, %arg0 : i32, i32, i32
  }
  func.func @transform_2(%arg0: i32, %arg1: i32, %arg2: i32, %arg3: memref<5xi32, #tpu.memory_space<smem>>, %arg4: memref<5xi32, #tpu.memory_space<smem>>, %arg5: memref<5xi32, #tpu.memory_space<smem>>) -> (i32, i32, i32) {
    %0 = arith.index_cast %arg1 : i32 to index
    %1 = memref.load %arg3[%0] : memref<5xi32, #tpu.memory_space<smem>>
    %c0_i32 = arith.constant 0 : i32
    %c0_i32_0 = arith.constant 0 : i32
    return %1, %c0_i32, %arg0 : i32, i32, i32
  }
  func.func @transform_3(%arg0: i32, %arg1: i32, %arg2: i32, %arg3: memref<5xi32, #tpu.memory_space<smem>>, %arg4: memref<5xi32, #tpu.memory_space<smem>>, %arg5: memref<5xi32, #tpu.memory_space<smem>>) -> (i32, i32) {
    %c0_i32 = arith.constant 0 : i32
    return %arg1, %arg0 : i32, i32
  }
}

</mosaic_0001>

<bundles_post_ra>
// kernel: custom-call
= control target key start
LH: loop header
LB: loop body
LE: loop exit
PB: predicated region body
PF: predicated region fallthrough
CT: control target
= control target key end

     0   :  { %s6_s0 = inlined_call_operand.vmem [shape: u32[5], index: 0, kind: output, shape index: {}]  }

// kernel: custom-call.2
= control target key start
LH: loop header
LB: loop body
LE: loop exit
PB: predicated region body
PF: predicated region fallthrough
CT: control target
= control target key end

     0   :  { %s6_s0 = inlined_call_operand.vmem [shape: u32[8], index: 0, kind: output, shape index: {}]  }

// kernel: fmoe_linear.1
= control target key start
LH: loop header
LB: loop body
LE: loop exit
PB: predicated region body
PF: predicated region fallthrough
CT: control target
= control target key end

     0   :  { %s842_s0 = inlined_call_operand.vmem [shape: s32[5], index: 0, kind: input, shape index: {}]   ;;  %s843_s3 = inlined_call_operand.vmem [shape: f32[40,128], index: 3, kind: input, shape index: {}]   ;;  %s844_s4 = inlined_call_operand.vmem [shape: f32[4,128,128], index: 4, kind: input, shape index: {}]   ;;  %s845_s5 = inlined_call_operand.vmem [shape: f32[4,1,128], index: 5, kind: input, shape index: {}]   ;;  %s846_s6 = inlined_call_operand.vmem [shape: f32[40,128], index: 6, kind: output, shape index: {}]   ;;  %s847_s1 = inlined_call_operand.vmem [shape: s32[5], index: 1, kind: input, shape index: {}]   ;;  %s848_s2 = inlined_call_operand.vmem [shape: s32[5], index: 2, kind: input, shape index: {}]  }
   0x1   :  { %s11_s23 = sshll.u32 %s842_s0, 4  ;;  %s15_s26 = sshll.u32 %s847_s1, 4  ;;  %s12_s23 = int_to_ptr.vmem [resolvable:$true] %s11_s23  ;;  %s16_s26 = int_to_ptr.vmem [resolvable:$true] %s15_s26 }
   0x2   :  { %s654_s27 = scalar_lea.vmem %s12_s23, 16  ;;  %p659_p1 = scmp.lt.s32.totalorder %s12_s23, %s12_s23 }
   0x3   :  { %p655_p0 = scmp.ne.s32.totalorder %s12_s23, %s654_s27  ;;  %p660_p2 = scmp.lt.s32.totalorder %s654_s27, %s654_s27 }
   0x5   :  { %p661_p3 = por %p660_p2, %p659_p1 }
   0x7   :  { %p662_p4 = pnand %p661_p3, %p655_p0 }
   0x9   :  { %665 = shalt.err (!%p662_p4)  }
   0xa   :  { %s716_s28 = smov [#allocation3]   ;;  %s666_s29 = scalar_lea.vmem %s16_s26, 16 }
   0xb   :  { %14 = dma.vmem_to_smem %s12_s23, 16, %s716_s28, [#allocation2] }
   0xc   :  { %p667_p5 = scmp.ne.s32.totalorder %s16_s26, %s666_s29  ;;  %p671_p6 = scmp.lt.s32.totalorder %s16_s26, %s16_s26 }
   0xd   :  { %p672_p7 = scmp.lt.s32.totalorder %s666_s29, %s666_s29 }
   0xf   :  { %p673_p8 = por %p672_p7, %p671_p6 }
  0x11   :  { %p674_p9 = pnand %p673_p8, %p667_p5 }
  0x13   :  { %677 = shalt.err (!%p674_p9)  }
  0x14   :  { %s717_s0 = smov [#allocation4]   ;;  %s19_s7 = sshll.u32 %s848_s2, 4  ;;  %s20_s7 = int_to_ptr.vmem [resolvable:$true] %s19_s7 }
  0x15   :  { %18 = dma.vmem_to_smem %s16_s26, 16, %s717_s0, [#allocation2] }
  0x16   :  { %s678_s8 = scalar_lea.vmem %s20_s7, 16  ;;  %p683_p11 = scmp.lt.s32.totalorder %s20_s7, %s20_s7 }
  0x17   :  { %p679_p10 = scmp.ne.s32.totalorder %s20_s7, %s678_s8  ;;  %p684_p12 = scmp.lt.s32.totalorder %s678_s8, %s678_s8 }
  0x19   :  { %p685_p13 = por %p684_p12, %p683_p11 }
  0x1b   :  { %p686_p0 = pnand %p685_p13, %p679_p10 }
  0x1d   :  { %689 = shalt.err (!%p686_p0)  }
  0x1e   :  { %s718_s9 = smov [#allocation5]  }
  0x1f   :  { %22 = dma.vmem_to_smem %s20_s7, 16, %s718_s9, [#allocation2] }
  0x20   :  { %702 = dma.done.wait [#allocation2], 48 }
  0x21   :  { %703 = vsyncadd [#allocation2], 4294967248 }
  0x22   :  { %24 = sfence }
  0x23   :  { %s766_s10 = smov 0   ;;  %s768_s11 = smov 0  }
  0x24   :  { %s770_s12 = smov 0  }
  0x25 LB: > { %s45_s2 = sadd.s32 1, %s710_s11  ;;  %p561_p1 = scmp.ge.s32.totalorder %s714_s12, 1  ;;  %s714_s12 = sphi %s770_s12, %s30_s12   ;;  %s710_s11 = sphi %s768_s11, %s850_s11   ;;  %s706_s10 = sphi %s766_s10, %s849_s10  }
  0x26   : > { %p47_p2 = scmp.ge.s32.totalorder %s45_s2, 5  ;;  %p242_p3 = scmp.lt.s32.totalorder %s714_s12, 6 }
  0x28   : > { %s852_s2 = smov (%p47_p2, %s45_s2), 0  ;;  %p243_p4 = pnand %p561_p1, %p242_p3 }
  0x29   : > { %s296_s13 = sld [smem:[#allocation4 + %s706_s10]] (!%p243_p4)  ;;  %p335_p5 = scmp.lt.s32.totalorder (!%p243_p4), %s706_s10, 4 }
  0x2a   : > { %246 = sbr.rel (%p243_p4) target bundleno = 299 (0x12b), region = 32  ;;  %s309_s14 = sld [smem:[#allocation3 + %s706_s10]] (!%p243_p4) }
  0x2b   : > { %s327_s15 = sld [smem:[#allocation3 + %s706_s10]] (!%p243_p4) }
  0x2c   : > { %s784_s17 = sld [smem:[#allocation5 + %s706_s10]] (!%p243_p4) }
  0x2f   : > { %s336_s16 = scalar_select %p335_p5, %s706_s10, 4 }
  0x30   : > { %p298_p6 = scmp.lt.s32.totalorder %s296_s13, 4  ;;  %p312_p7 = scmp.lt.s32.totalorder %s309_s14, 3 }
  0x31   : > { %s565_s18 = sshll.u32 %s336_s16, 3  ;;  %p328_p8 = scmp.lt.s32.totalorder %s327_s15, 3 }
  0x32   : > { %s789_s21 = scalar_lea.vmem %s846_s6, %s565_s18  ;;  %s854_s13 = smov (!%p298_p6, %s296_s13), 4 }
  0x33   : > { %s856_s14 = smov (!%p312_p7, %s309_s14), 3  ;;  %s562_s22 = sshll.u32 %s854_s13, 3 }
  0x34   : > { %s794_s25 = scalar_lea.vmem %s843_s3, %s562_s22  ;;  %s571_s26 = sshll.u32 %s856_s14, 7 }
  0x35   : > { %s799_s29 = scalar_lea.vmem %s844_s4, %s571_s26  ;;  %s858_s15 = smov (!%p328_p8, %s327_s15), 3 }
  0x36   : > { %s333_s30 = scalar_lea.vmem %s845_s5, %s858_s15  ;;  %p566_p9 = scmp.ne.s32.totalorder %s784_s17, 1 }
  0x38   : > { %346 = sbr.rel (%p566_p9) target bundleno = 290 (0x122), region = 36 }
  0x3d   : > { %v363_v0 = vld [vmem:[%s799_s29 + $0x78] sm:$0xff]  ;;  %v719_v1 = vmov 0.0   ;;  %v362_v2 = vld [vmem:[%s799_s29 + $0x70] sm:$0xff]  ;;  %vm720_vm0 = vmmov 0   ;;  %v361_v3 = vld [vmem:[%s799_s29 + $0x68] sm:$0xff] }
  0x3e   : > { %589 = vmatprep.subr.mxu0 %v719_v1  ;;  %621 = vmatprep.mubr.msk.f32.mxu0 %vm720_vm0, %v719_v1  ;;  %v360_v4 = vld [vmem:[%s799_s29 + $0x60] sm:$0xff]  ;;  %v359_v5 = vld [vmem:[%s799_s29 + $0x58] sm:$0xff]  ;;  %v358_v6 = vld [vmem:[%s799_s29 + $0x50] sm:$0xff] }
  0x3f   : > { %590 = vmatpush3.msra.mxu0 %v363_v0  ;;  %v357_v7 = vld [vmem:[%s799_s29 + $0x48] sm:$0xff]  ;;  %v356_v8 = vld [vmem:[%s799_s29 + $0x40] sm:$0xff]  ;;  %v355_v9 = vld [vmem:[%s799_s29 + $0x38] sm:$0xff] }
  0x40   : > { %591 = vmatprep.subr.mxu0 %v719_v1  ;;  %v354_v10 = vld [vmem:[%s799_s29 + $0x30] sm:$0xff]  ;;  %v353_v11 = vld [vmem:[%s799_s29 + $0x28] sm:$0xff]  ;;  %v352_v12 = vld [vmem:[%s799_s29 + $0x20] sm:$0xff] }
  0x41   : > { %592 = vmatpush3.msra.mxu0 %v362_v2  ;;  %v351_v13 = vld [vmem:[%s799_s29 + $0x18] sm:$0xff]  ;;  %v350_v14 = vld [vmem:[%s799_s29 + $0x10] sm:$0xff]  ;;  %v349_v15 = vld [vmem:[%s799_s29 + $0x8] sm:$0xff] }
  0x42   : > { %593 = vmatprep.subr.mxu0 %v719_v1  ;;  %v348_v16 = vld [vmem:[%s799_s29] sm:$0xff] }
  0x43   : > { %594 = vmatpush3.msra.mxu0 %v361_v3  ;;  %v347_v17 = vld [vmem:[%s794_s25] sm:$0xff] }
  0x44   : > { %595 = vmatprep.subr.mxu0 %v719_v1  ;;  %v567_v18 = vld [vmem:[%s333_s30] ss:$0 sm:$0xff] }
  0x45   : > { %596 = vmatpush3.msra.mxu0 %v360_v4 }
  0x46   : > { %597 = vmatprep.subr.mxu0 %v719_v1 }
  0x47   : > { %598 = vmatpush3.msra.mxu0 %v359_v5 }
  0x48   : > { %599 = vmatprep.subr.mxu0 %v719_v1 }
  0x49   : > { %600 = vmatpush3.msra.mxu0 %v358_v6 }
  0x4a   : > { %601 = vmatprep.subr.mxu0 %v719_v1 }
  0x4b   : > { %602 = vmatpush3.msra.mxu0 %v357_v7 }
  0x4c   : > { %603 = vmatprep.subr.mxu0 %v719_v1 }
  0x4d   : > { %604 = vmatpush3.msra.mxu0 %v356_v8 }
  0x4e   : > { %605 = vmatprep.subr.mxu0 %v719_v1 }
  0x4f   : > { %606 = vmatpush3.msra.mxu0 %v355_v9 }
  0x50   : > { %607 = vmatprep.subr.mxu0 %v719_v1 }
  0x51   : > { %608 = vmatpush3.msra.mxu0 %v354_v10 }
  0x52   : > { %609 = vmatprep.subr.mxu0 %v719_v1 }
  0x53   : > { %610 = vmatpush3.msra.mxu0 %v353_v11 }
  0x54   : > { %611 = vmatprep.subr.mxu0 %v719_v1 }
  0x55   : > { %612 = vmatpush3.msra.mxu0 %v352_v12 }
  0x56   : > { %613 = vmatprep.subr.mxu0 %v719_v1 }
  0x57   : > { %614 = vmatpush3.msra.mxu0 %v351_v13 }
  0x58   : > { %615 = vmatprep.subr.mxu0 %v719_v1 }
  0x59   : > { %616 = vmatpush3.msra.mxu0 %v350_v14 }
  0x5a   : > { %617 = vmatprep.subr.mxu0 %v719_v1 }
  0x5b   : > { %618 = vmatpush3.msra.mxu0 %v349_v15 }
  0x5c   : > { %619 = vmatprep.subr.mxu0 %v719_v1 }
  0x5d   : > { %620 = vmatpush3.msra.mxu0 %v348_v16 }
  0x5e   : > { %622 = vmatmul.mubr.f32.vlgmr.msra.gmra.mxu0 %v347_v17 }
 0x11e   : > { %v437_v19 = vpop.f32.mrf.mxu0 }
 0x11f   : > { %v438_v20 = vadd.f32 %v567_v18, %v437_v19 }
 0x120   : > { %v623_v21 = vpop.f32.mrf.mxu0 }
 0x121   : > { %441 = vst [vmem:[%s789_s21] sm:$0xff] %v438_v20 }
 0x122 PF: > { %p568_p10 = scmp.ne.s32.totalorder %s784_s17, 0 }
 0x124   : > { %445 = sbr.rel (%p568_p10) target bundleno = 299 (0x12b), region = 40 }
 0x129   : > { %v721_v22 = vmov 0.0  }
 0x12a   : > { %446 = vst [vmem:[%s789_s21] sm:$0xff] %v721_v22 }
 0x12b PF: > { %s30_s12 = sadd.s32 1, %s714_s12   ;;  %s849_s10 = smov %s710_s11 }
 0x12c   : > { %p27_p11 = scmp.ge.s32.totalorder %s30_s12, 7   ;;  %s850_s11 = smov %s852_s2 }
 0x12e   :  { %29 = sbr.rel (!%p27_p11) target bundleno = 37 (0x25), region = 76 }

</bundles_post_ra>
